<compile_context>
chip_gen: v6e
topology: v6e:2x2x1
jax: 0.10.0
libtpu: 0.0.40
codegen_flags: <defaults>
</compile_context>

<pallas_src>
import functools

import jax
import jax.numpy as jnp
from jax.experimental import pallas as pl
from jax.experimental.pallas import tpu as pltpu

LATENT = 10      # true latent size (nn.Linear(512, 10))
LAT_PAD = 128    # lane-padded latent size
HIDDEN = 512


def _round_up(a, m):
    return (a + m - 1) // m * m


def vae_forward_kernel(x_ref, eps_ref,
                       w1_ref, b1_ref,
                       wenc_ref, benc_ref,
                       w3_ref, b3_ref,
                       w4_ref, b4_ref,
                       recon_ref, mulv_ref):
    # encode: h1 = relu(x @ W1 + b1)      (bf16 operands, f32 accumulation)
    x = x_ref[...].astype(jnp.bfloat16)
    h1 = jnp.dot(x, w1_ref[...], preferred_element_type=jnp.float32) + b1_ref[...]
    h1 = jnp.maximum(h1, 0.0)

    # fused fc21/fc22: one matmul produces [mu | logvar] in a lane-dense slab
    mulv = jnp.dot(h1.astype(jnp.bfloat16), wenc_ref[...],
                   preferred_element_type=jnp.float32) + benc_ref[...]
    mu = mulv[:, :LAT_PAD]        # real values in lanes [0, LATENT)
    logvar = mulv[:, LAT_PAD:]    # real values in lanes [0, LATENT)

    # reparameterize: z = eps * exp(0.5 * logvar) + mu
    # (padded lanes: mu = logvar = 0, eps = 0  =>  z = 0, exact)
    std = jnp.exp(0.5 * logvar)
    z = eps_ref[...] * std + mu

    # decode: recon = sigmoid(relu(z @ W3 + b3) @ W4 + b4)
    h3 = jnp.dot(z.astype(jnp.bfloat16), w3_ref[...],
                 preferred_element_type=jnp.float32) + b3_ref[...]
    h3 = jnp.maximum(h3, 0.0)
    logits = jnp.dot(h3.astype(jnp.bfloat16), w4_ref[...],
                     preferred_element_type=jnp.float32) + b4_ref[...]

    recon_ref[...] = jax.nn.sigmoid(logits)
    mulv_ref[...] = mulv


def prepare_params(p, input_size):
    """Pad / fuse / downcast PyTorch-style params into the kernel layout."""
    f_pad = _round_up(input_size, 128)

    def pad2d(a, shape):
        out = jnp.zeros(shape, a.dtype)
        return out.at[: a.shape[0], : a.shape[1]].set(a)

    w1p = pad2d(p["w1"], (f_pad, HIDDEN)).astype(jnp.bfloat16)
    b1 = p["b1"].astype(jnp.float32)

    wenc = jnp.zeros((HIDDEN, 2 * LAT_PAD), jnp.float32)
    wenc = wenc.at[:, :LATENT].set(p["w21"])
    wenc = wenc.at[:, LAT_PAD:LAT_PAD + LATENT].set(p["w22"]).astype(jnp.bfloat16)
    benc = jnp.zeros((1, 2 * LAT_PAD), jnp.float32)
    benc = benc.at[:, :LATENT].set(p["b21"])
    benc = benc.at[:, LAT_PAD:LAT_PAD + LATENT].set(p["b22"])

    w3p = pad2d(p["w3"], (LAT_PAD, HIDDEN)).astype(jnp.bfloat16)
    b3 = p["b3"].astype(jnp.float32)

    w4p = pad2d(p["w4"], (HIDDEN, f_pad)).astype(jnp.bfloat16)
    b4p = jnp.zeros((1, f_pad), jnp.float32).at[:, :input_size].set(p["b4"])

    return dict(w1=w1p, b1=b1, wenc=wenc, benc=benc,
                w3=w3p, b3=b3, w4=w4p, b4=b4p)


@functools.partial(jax.jit, static_argnames=("input_size", "block_b"))
def vae_forward(x, eps, kp, *, input_size, block_b=256):
    B = x.shape[0]
    f_pad = _round_up(input_size, 128)

    # batch tile: multiple of 8 sublanes, capped so activations stay small in VMEM
    tb = min(_round_up(B, 8), block_b)
    b_pad = _round_up(B, tb)

    x_p = jnp.zeros((b_pad, f_pad), jnp.float32).at[:B, :input_size].set(x)
    eps_p = jnp.zeros((b_pad, LAT_PAD), jnp.float32).at[:B, :LATENT].set(eps)

    grid = (b_pad // tb,)

    def act_spec(width):
        return pl.BlockSpec((tb, width), lambda i: (i, 0))

    def resident(shape):
        # weights/biases: same block every step -> fetched once, stay in VMEM
        return pl.BlockSpec(shape, lambda i: (0, 0))

    recon_p, mulv = pl.pallas_call(
        vae_forward_kernel,
        grid=grid,
        out_shape=(
            jax.ShapeDtypeStruct((b_pad, f_pad), jnp.float32),       # recon (padded)
            jax.ShapeDtypeStruct((b_pad, 2 * LAT_PAD), jnp.float32),  # [mu | logvar]
        ),
        in_specs=[
            act_spec(f_pad),                       # x
            act_spec(LAT_PAD),                     # eps
            resident((f_pad, HIDDEN)),             # w1
            resident((1, HIDDEN)),                 # b1
            resident((HIDDEN, 2 * LAT_PAD)),       # wenc (fused fc21/fc22)
            resident((1, 2 * LAT_PAD)),            # benc
            resident((LAT_PAD, HIDDEN)),           # w3
            resident((1, HIDDEN)),                 # b3
            resident((HIDDEN, f_pad)),             # w4
            resident((1, f_pad)),                  # b4
        ],
        out_specs=(act_spec(f_pad), act_spec(2 * LAT_PAD)),
        compiler_params=pltpu.CompilerParams(
            dimension_semantics=("parallel",),     # v7x: shard batch over 2 TCs
        ),
    )(x_p, eps_p,
      kp["w1"], kp["b1"], kp["wenc"], kp["benc"],
      kp["w3"], kp["b3"], kp["w4"], kp["b4"])

    recon = recon_p[:B, :input_size]
    mu = mulv[:B, :LATENT]
    logvar = mulv[:B, LAT_PAD:LAT_PAD + LATENT]
    return recon, mu, logvar


def init_params(key, input_size):
    """Deterministic PyTorch-style init (U(-1/sqrt(fan_in), 1/sqrt(fan_in)))."""
    dims = {
        "1": (input_size, HIDDEN),
        "21": (HIDDEN, LATENT),
        "22": (HIDDEN, LATENT),
        "3": (LATENT, HIDDEN),
        "4": (HIDDEN, input_size),
    }
    params = {}
    for name, (fan_in, fan_out) in dims.items():
        key, kw, kb = jax.random.split(key, 3)
        bound = 1.0 / jnp.sqrt(jnp.float32(fan_in))
        params[f"w{name}"] = jax.random.uniform(
            kw, (fan_in, fan_out), jnp.float32, -bound, bound)
        params[f"b{name}"] = jax.random.uniform(
            kb, (1, fan_out), jnp.float32, -bound, bound)
    return params


def vae_forward_ref(x, eps, p):
    """Pure-JAX reference with the same bf16-matmul / f32-accumulate recipe."""
    def mm(a, w):
        return jnp.dot(a.astype(jnp.bfloat16), w.astype(jnp.bfloat16),
                       preferred_element_type=jnp.float32)
    h1 = jnp.maximum(mm(x, p["w1"]) + p["b1"], 0.0)
    mu = mm(h1, p["w21"]) + p["b21"]
    logvar = mm(h1, p["w22"]) + p["b22"]
    z = eps * jnp.exp(0.5 * logvar) + mu
    h3 = jnp.maximum(mm(z, p["w3"]) + p["b3"], 0.0)
    recon = jax.nn.sigmoid(mm(h3, p["w4"]) + p["b4"])
    return recon, mu, logvar


if __name__ == "__main__":
    key = jax.random.PRNGKey(0)
    k_params, k_x, k_eps = jax.random.split(key, 3)

    batch = 8
    input_size = 64

    params = init_params(k_params, input_size)
    kernel_params = prepare_params(params, input_size)

    x = jax.random.uniform(k_x, (batch, input_size), jnp.float32)   # [0,1] inputs
    eps = jax.random.normal(k_eps, (batch, LATENT), jnp.float32)    # randn_like draw

    recon, mu, logvar = vae_forward(x, eps, kernel_params, input_size=input_size)
    jax.block_until_ready((recon, mu, logvar))

    # sanity check against pure-JAX reference (same bf16 matmul recipe)
    r_ref, mu_ref, lv_ref = vae_forward_ref(x, eps, params)
    assert recon.shape == (batch, input_size)
    assert mu.shape == (batch, LATENT) and logvar.shape == (batch, LATENT)
    assert jnp.allclose(recon, r_ref, atol=1e-2, rtol=1e-2)
    assert jnp.allclose(mu, mu_ref, atol=1e-2, rtol=1e-2)
    assert jnp.allclose(logvar, lv_ref, atol=1e-2, rtol=1e-2)

    print("KERNEL_OK")
</pallas_src>

<mosaic_0001>
module attributes {stable_mosaic.version = 11 : i64} {
  func.func @vae_forward_kernel(%arg0: i32, %arg1: memref<8x128xf32, #tpu.memory_space<vmem>>, %arg2: memref<8x128xf32, #tpu.memory_space<vmem>>, %arg3: memref<128x512xbf16, #tpu.memory_space<vmem>>, %arg4: memref<1x512xf32, #tpu.memory_space<vmem>>, %arg5: memref<512x256xbf16, #tpu.memory_space<vmem>>, %arg6: memref<1x256xf32, #tpu.memory_space<vmem>>, %arg7: memref<128x512xbf16, #tpu.memory_space<vmem>>, %arg8: memref<1x512xf32, #tpu.memory_space<vmem>>, %arg9: memref<512x128xbf16, #tpu.memory_space<vmem>>, %arg10: memref<1x128xf32, #tpu.memory_space<vmem>>, %arg11: memref<8x128xf32, #tpu.memory_space<vmem>>, %arg12: memref<8x256xf32, #tpu.memory_space<vmem>>) attributes {dimension_semantics = [#tpu.dimension_semantics<parallel>], iteration_bounds = array<i64: 1>, scalar_prefetch = 0 : i64, scratch_operands = 0 : i64, tpu.core_type = #tpu.core_type<tc>, window_params = [{transform_indices = @transform_0, window_bounds = array<i64: 8, 128>}, {transform_indices = @transform_1, window_bounds = array<i64: 8, 128>}, {pipeline_mode = #tpu.pipeline_mode<synchronous>, transform_indices = @transform_2, window_bounds = array<i64: 128, 512>}, {pipeline_mode = #tpu.pipeline_mode<synchronous>, transform_indices = @transform_3, window_bounds = array<i64: 1, 512>}, {pipeline_mode = #tpu.pipeline_mode<synchronous>, transform_indices = @transform_4, window_bounds = array<i64: 512, 256>}, {pipeline_mode = #tpu.pipeline_mode<synchronous>, transform_indices = @transform_5, window_bounds = array<i64: 1, 256>}, {pipeline_mode = #tpu.pipeline_mode<synchronous>, transform_indices = @transform_6, window_bounds = array<i64: 128, 512>}, {pipeline_mode = #tpu.pipeline_mode<synchronous>, transform_indices = @transform_7, window_bounds = array<i64: 1, 512>}, {pipeline_mode = #tpu.pipeline_mode<synchronous>, transform_indices = @transform_8, window_bounds = array<i64: 512, 128>}, {pipeline_mode = #tpu.pipeline_mode<synchronous>, transform_indices = @transform_9, window_bounds = array<i64: 1, 128>}, {transform_indices = @transform_10, window_bounds = array<i64: 8, 128>}, {transform_indices = @transform_11, window_bounds = array<i64: 8, 256>}]} {
    %c0 = arith.constant 0 : index
    %c0_0 = arith.constant 0 : index
    %0 = vector.load %arg1[%c0, %c0_0] : memref<8x128xf32, #tpu.memory_space<vmem>>, vector<8x128xf32>
    %1 = arith.truncf %0 : vector<8x128xf32> to vector<8x128xbf16>
    %c0_1 = arith.constant 0 : index
    %c0_2 = arith.constant 0 : index
    %2 = vector.load %arg3[%c0_1, %c0_2] : memref<128x512xbf16, #tpu.memory_space<vmem>>, vector<128x512xbf16>
    %cst = arith.constant dense<0.000000e+00> : vector<8x512xf32>
    %3 = tpu.matmul %1, %2, %cst {dimension_numbers = #tpu.dot_dimension_numbers<[1], [0], [0], [1], [0, 0, 1, 1], [], []>} : vector<8x128xbf16>, vector<128x512xbf16>, vector<8x512xf32> -> vector<8x512xf32>
    %c0_3 = arith.constant 0 : index
    %c0_4 = arith.constant 0 : index
    %4 = vector.load %arg4[%c0_3, %c0_4] : memref<1x512xf32, #tpu.memory_space<vmem>>, vector<1x512xf32>
    %5 = vector.broadcast %4 : vector<1x512xf32> to vector<8x512xf32>
    %6 = arith.addf %3, %5 : vector<8x512xf32>
    %cst_5 = arith.constant 0.000000e+00 : f32
    %7 = vector.broadcast %cst_5 : f32 to vector<8x512xf32>
    %8 = arith.maximumf %6, %7 : vector<8x512xf32>
    %9 = arith.truncf %8 : vector<8x512xf32> to vector<8x512xbf16>
    %c0_6 = arith.constant 0 : index
    %c0_7 = arith.constant 0 : index
    %10 = vector.load %arg5[%c0_6, %c0_7] : memref<512x256xbf16, #tpu.memory_space<vmem>>, vector<512x256xbf16>
    %cst_8 = arith.constant dense<0.000000e+00> : vector<8x256xf32>
    %11 = tpu.matmul %9, %10, %cst_8 {dimension_numbers = #tpu.dot_dimension_numbers<[1], [0], [0], [1], [0, 0, 1, 1], [], []>} : vector<8x512xbf16>, vector<512x256xbf16>, vector<8x256xf32> -> vector<8x256xf32>
    %c0_9 = arith.constant 0 : index
    %c0_10 = arith.constant 0 : index
    %12 = vector.load %arg6[%c0_9, %c0_10] : memref<1x256xf32, #tpu.memory_space<vmem>>, vector<1x256xf32>
    %13 = vector.broadcast %12 : vector<1x256xf32> to vector<8x256xf32>
    %14 = arith.addf %11, %13 : vector<8x256xf32>
    %15 = vector.extract_strided_slice %14 {offsets = [0, 0], sizes = [8, 128], strides = [1, 1]} : vector<8x256xf32> to vector<8x128xf32>
    %16 = vector.extract_strided_slice %14 {offsets = [0, 128], sizes = [8, 128], strides = [1, 1]} : vector<8x256xf32> to vector<8x128xf32>
    %cst_11 = arith.constant 5.000000e-01 : f32
    %17 = vector.broadcast %cst_11 : f32 to vector<8x128xf32>
    %18 = arith.mulf %17, %16 : vector<8x128xf32>
    %19 = math.exp %18 : vector<8x128xf32>
    %c0_12 = arith.constant 0 : index
    %c0_13 = arith.constant 0 : index
    %20 = vector.load %arg2[%c0_12, %c0_13] : memref<8x128xf32, #tpu.memory_space<vmem>>, vector<8x128xf32>
    %21 = arith.mulf %20, %19 : vector<8x128xf32>
    %22 = arith.addf %21, %15 : vector<8x128xf32>
    %23 = arith.truncf %22 : vector<8x128xf32> to vector<8x128xbf16>
    %c0_14 = arith.constant 0 : index
    %c0_15 = arith.constant 0 : index
    %24 = vector.load %arg7[%c0_14, %c0_15] : memref<128x512xbf16, #tpu.memory_space<vmem>>, vector<128x512xbf16>
    %cst_16 = arith.constant dense<0.000000e+00> : vector<8x512xf32>
    %25 = tpu.matmul %23, %24, %cst_16 {dimension_numbers = #tpu.dot_dimension_numbers<[1], [0], [0], [1], [0, 0, 1, 1], [], []>} : vector<8x128xbf16>, vector<128x512xbf16>, vector<8x512xf32> -> vector<8x512xf32>
    %c0_17 = arith.constant 0 : index
    %c0_18 = arith.constant 0 : index
    %26 = vector.load %arg8[%c0_17, %c0_18] : memref<1x512xf32, #tpu.memory_space<vmem>>, vector<1x512xf32>
    %27 = vector.broadcast %26 : vector<1x512xf32> to vector<8x512xf32>
    %28 = arith.addf %25, %27 : vector<8x512xf32>
    %cst_19 = arith.constant 0.000000e+00 : f32
    %29 = vector.broadcast %cst_19 : f32 to vector<8x512xf32>
    %30 = arith.maximumf %28, %29 : vector<8x512xf32>
    %31 = arith.truncf %30 : vector<8x512xf32> to vector<8x512xbf16>
    %c0_20 = arith.constant 0 : index
    %c0_21 = arith.constant 0 : index
    %32 = vector.load %arg9[%c0_20, %c0_21] : memref<512x128xbf16, #tpu.memory_space<vmem>>, vector<512x128xbf16>
    %cst_22 = arith.constant dense<0.000000e+00> : vector<8x128xf32>
    %33 = tpu.matmul %31, %32, %cst_22 {dimension_numbers = #tpu.dot_dimension_numbers<[1], [0], [0], [1], [0, 0, 1, 1], [], []>} : vector<8x512xbf16>, vector<512x128xbf16>, vector<8x128xf32> -> vector<8x128xf32>
    %c0_23 = arith.constant 0 : index
    %c0_24 = arith.constant 0 : index
    %34 = vector.load %arg10[%c0_23, %c0_24] : memref<1x128xf32, #tpu.memory_space<vmem>>, vector<1x128xf32>
    %35 = vector.broadcast %34 : vector<1x128xf32> to vector<8x128xf32>
    %36 = arith.addf %33, %35 : vector<8x128xf32>
    %37 = arith.negf %36 : vector<8x128xf32>
    %38 = math.exp %37 : vector<8x128xf32>
    %cst_25 = arith.constant 1.000000e+00 : f32
    %39 = vector.broadcast %cst_25 : f32 to vector<8x128xf32>
    %40 = arith.addf %39, %38 : vector<8x128xf32>
    %41 = arith.divf %39, %40 : vector<8x128xf32>
    %c0_26 = arith.constant 0 : index
    %c0_27 = arith.constant 0 : index
    %42 = vector.load %arg11[%c0_26, %c0_27] : memref<8x128xf32, #tpu.memory_space<vmem>>, vector<8x128xf32>
    tpu.vector_store %arg11[%c0_26, %c0_27], %41 {strides = array<i32>} : memref<8x128xf32, #tpu.memory_space<vmem>>, vector<8x128xf32>,
    %c0_28 = arith.constant 0 : index
    %c0_29 = arith.constant 0 : index
    %43 = vector.load %arg12[%c0_28, %c0_29] : memref<8x256xf32, #tpu.memory_space<vmem>>, vector<8x256xf32>
    tpu.vector_store %arg12[%c0_28, %c0_29], %14 {strides = array<i32>} : memref<8x256xf32, #tpu.memory_space<vmem>>, vector<8x256xf32>,
    return
  }
  func.func @transform_0(%arg0: i32) -> (i32, i32) {
    %c0_i32 = arith.constant 0 : i32
    %c0_i32_0 = arith.constant 0 : i32
    return %arg0, %c0_i32 : i32, i32
  }
  func.func @transform_1(%arg0: i32) -> (i32, i32) {
    %c0_i32 = arith.constant 0 : i32
    %c0_i32_0 = arith.constant 0 : i32
    return %arg0, %c0_i32 : i32, i32
  }
  func.func @transform_2(%arg0: i32) -> (i32, i32) {
    %c0_i32 = arith.constant 0 : i32
    %c0_i32_0 = arith.constant 0 : i32
    %c0_i32_1 = arith.constant 0 : i32
    return %c0_i32, %c0_i32_0 : i32, i32
  }
  func.func @transform_3(%arg0: i32) -> (i32, i32) {
    %c0_i32 = arith.constant 0 : i32
    %c0_i32_0 = arith.constant 0 : i32
    %c0_i32_1 = arith.constant 0 : i32
    return %c0_i32, %c0_i32_0 : i32, i32
  }
  func.func @transform_4(%arg0: i32) -> (i32, i32) {
    %c0_i32 = arith.constant 0 : i32
    %c0_i32_0 = arith.constant 0 : i32
    %c0_i32_1 = arith.constant 0 : i32
    return %c0_i32, %c0_i32_0 : i32, i32
  }
  func.func @transform_5(%arg0: i32) -> (i32, i32) {
    %c0_i32 = arith.constant 0 : i32
    %c0_i32_0 = arith.constant 0 : i32
    %c0_i32_1 = arith.constant 0 : i32
    return %c0_i32, %c0_i32_0 : i32, i32
  }
  func.func @transform_6(%arg0: i32) -> (i32, i32) {
    %c0_i32 = arith.constant 0 : i32
    %c0_i32_0 = arith.constant 0 : i32
    %c0_i32_1 = arith.constant 0 : i32
    return %c0_i32, %c0_i32_0 : i32, i32
  }
  func.func @transform_7(%arg0: i32) -> (i32, i32) {
    %c0_i32 = arith.constant 0 : i32
    %c0_i32_0 = arith.constant 0 : i32
    %c0_i32_1 = arith.constant 0 : i32
    return %c0_i32, %c0_i32_0 : i32, i32
  }
  func.func @transform_8(%arg0: i32) -> (i32, i32) {
    %c0_i32 = arith.constant 0 : i32
    %c0_i32_0 = arith.constant 0 : i32
    %c0_i32_1 = arith.constant 0 : i32
    return %c0_i32, %c0_i32_0 : i32, i32
  }
  func.func @transform_9(%arg0: i32) -> (i32, i32) {
    %c0_i32 = arith.constant 0 : i32
    %c0_i32_0 = arith.constant 0 : i32
    %c0_i32_1 = arith.constant 0 : i32
    return %c0_i32, %c0_i32_0 : i32, i32
  }
  func.func @transform_10(%arg0: i32) -> (i32, i32) {
    %c0_i32 = arith.constant 0 : i32
    %c0_i32_0 = arith.constant 0 : i32
    return %arg0, %c0_i32 : i32, i32
  }
  func.func @transform_11(%arg0: i32) -> (i32, i32) {
    %c0_i32 = arith.constant 0 : i32
    %c0_i32_0 = arith.constant 0 : i32
    return %arg0, %c0_i32 : i32, i32
  }
}

</mosaic_0001>

<bundles_post_ra>
// kernel: vae_forward.1
= control target key start
LH: loop header
LB: loop body
LE: loop exit
PB: predicated region body
PF: predicated region fallthrough
CT: control target
= control target key end

     0   :  { %17 = vsyncpa [#allocation3], 0  ;;  %s2257_s0 = inlined_call_operand.vmem [shape: f32[8,128], index: 0, kind: input, shape index: {}]   ;;  %s2258_s1 = inlined_call_operand.vmem [shape: f32[8,128], index: 1, kind: input, shape index: {}]   ;;  %s2259_s2 = inlined_call_operand.hbm [shape: bf16[128,512], index: 2, kind: input, shape index: {}]   ;;  %s2260_s3 = inlined_call_operand.vmem [shape: f32[1,512], index: 3, kind: input, shape index: {}]   ;;  %s2261_s4 = inlined_call_operand.hbm [shape: bf16[512,256], index: 4, kind: input, shape index: {}]   ;;  %s2262_s5 = inlined_call_operand.vmem [shape: f32[1,256], index: 5, kind: input, shape index: {}]   ;;  %s2263_s6 = inlined_call_operand.hbm [shape: bf16[128,512], index: 6, kind: input, shape index: {}]   ;;  %s2264_s7 = inlined_call_operand.vmem [shape: f32[1,512], index: 7, kind: input, shape index: {}]   ;;  %s2265_s8 = inlined_call_operand.hbm [shape: bf16[512,128], index: 8, kind: input, shape index: {}]   ;;  %s2266_s9 = inlined_call_operand.vmem [shape: f32[1,128], index: 9, kind: input, shape index: {}]   ;;  %s2267_s10 = inlined_call_operand.hbm [shape: f32[8,128], index: 10, kind: output, shape index: {0}]   ;;  %s2268_s11 = inlined_call_operand.vmem [shape: f32[8,256], index: 11, kind: output, shape index: {1}]  }
   0x1   :  { %18 = vsyncpa [#allocation6], 0 }
   0x2   :  { %19 = vsyncpa [#allocation9], 0 }
   0x3   :  { %20 = vsyncpa [#allocation4], 0  ;;  %s2118_s17 = smov [#allocation5]  }
   0x4   :  { %s44_s18 = sshll.u32 %s2118_s17, 4  ;;  %s45_s18 = int_to_ptr.vmem [resolvable:$true] %s44_s18 }
   0x5   :  { %s2018_s19 = scalar_lea.vmem %s45_s18, 8192  ;;  %p2023_p1 = scmp.lt.s32.totalorder %s45_s18, %s45_s18 }
   0x6   :  { %p2019_p0 = scmp.ne.s32.totalorder %s45_s18, %s2018_s19  ;;  %p2024_p2 = scmp.lt.s32.totalorder %s2018_s19, %s2018_s19 }
   0x8   :  { %p2025_p3 = por %p2024_p2, %p2023_p1 }
   0xa   :  { %p2026_p4 = pnand %p2025_p3, %p2019_p0 }
   0xc   :  { %2029 = shalt.err (!%p2026_p4)
}
   0xd   :  { %s2119_s20 = smov 128   ;;  %s2120_s21 = smov 8  }
   0xe   :  { %50 = dma.hbm_to_vmem [thread:$0]  %s2261_s4, 8192, %s45_s18, [#allocation6], %s2119_s20, %s2119_s20, %s2120_s21  }
   0xf   :  { %s2121_s24 = smov [#allocation2]  }
  0x10   :  { %s30_s25 = sshll.u32 %s2121_s24, 4  ;;  %s31_s25 = int_to_ptr.vmem [resolvable:$true] %s30_s25 }
  0x11   :  { %s2038_s26 = scalar_lea.vmem %s31_s25, 4096  ;;  %p2043_p6 = scmp.lt.s32.totalorder %s31_s25, %s31_s25 }
  0x12   :  { %p2039_p5 = scmp.ne.s32.totalorder %s31_s25, %s2038_s26  ;;  %p2044_p7 = scmp.lt.s32.totalorder %s2038_s26, %s2038_s26 }
  0x14   :  { %p2045_p8 = por %p2044_p7, %p2043_p6 }
  0x16   :  { %p2046_p9 = pnand %p2045_p8, %p2039_p5 }
  0x18   :  { %2049 = shalt.err (!%p2046_p9)
}
  0x19   :  { %s2122_s27 = smov 256   ;;  %s2123_s28 = smov 16  }
  0x1a   :  { %36 = dma.hbm_to_vmem [thread:$0]  %s2259_s2, 4096, %s31_s25, [#allocation3], %s2122_s27, %s2122_s27, %s2123_s28  }
  0x1b   :  { %s2124_s12 = smov [#allocation7]   ;;  %s2125_s14 = smov [#allocation8]  }
  0x1c   :  { %s58_s13 = sshll.u32 %s2124_s12, 4  ;;  %s72_s4 = sshll.u32 %s2125_s14, 4  ;;  %s59_s13 = int_to_ptr.vmem [resolvable:$true] %s58_s13  ;;  %s73_s4 = int_to_ptr.vmem [resolvable:$true] %s72_s4 }
  0x1d   :  { %s2058_s15 = scalar_lea.vmem %s59_s13, 4096  ;;  %p2063_p11 = scmp.lt.s32.totalorder %s59_s13, %s59_s13 }
  0x1e   :  { %p2059_p10 = scmp.ne.s32.totalorder %s59_s13, %s2058_s15  ;;  %p2064_p12 = scmp.lt.s32.totalorder %s2058_s15, %s2058_s15 }
  0x20   :  { %p2065_p13 = por %p2064_p12, %p2063_p11 }
  0x22   :  { %p2066_p0 = pnand %p2065_p13, %p2059_p10 }
  0x24   :  { %2069 = shalt.err (!%p2066_p0)
}
  0x25   :  { %64 = dma.hbm_to_vmem [thread:$0]  %s2263_s6, 4096, %s59_s13, [#allocation6], %s2122_s27, %s2122_s27, %s2123_s28  }
  0x26   :  { %s2078_s18 = scalar_lea.vmem %s73_s4, 4096  ;;  %p2083_p2 = scmp.lt.s32.totalorder %s73_s4, %s73_s4 }
  0x27   :  { %p2079_p1 = scmp.ne.s32.totalorder %s73_s4, %s2078_s18  ;;  %p2084_p3 = scmp.lt.s32.totalorder %s2078_s18, %s2078_s18 }
  0x29   :  { %p2085_p4 = por %p2084_p3, %p2083_p2 }
  0x2b   :  { %p2086_p5 = pnand %p2085_p4, %p2079_p1 }
  0x2d   :  { %2089 = shalt.err (!%p2086_p5)
}
  0x2e   :  { %s2126_s2 = smov 64   ;;  %s2127_s19 = smov 4  }
  0x2f   :  { %78 = dma.hbm_to_vmem [thread:$0]  %s2265_s8, 4096, %s73_s4, [#allocation9], %s2126_s2, %s2126_s2, %s2127_s19  }
  0x30   :  { %2110 = dma.done.wait [#allocation3], 4096  }
  0x31   :  { %2111 = vsyncadd [#allocation3], 4294963200 }
  0x32   :  { %2112 = dma.done.wait [#allocation6], 12288  }
  0x33   :  { %2113 = vsyncadd [#allocation6], 4294955008 }
  0x34   :  { %2114 = dma.done.wait [#allocation9], 4096  }
  0x35   :  { %2115 = vsyncadd [#allocation9], 4294963200  ;;  %v2128_v0 = vmov 0   ;;  %v1780_v1 = vld [vmem:[#allocation2 + $0xe4] ss:$16 sps:$4 sm:$0xff]   ;;  %s2129_s30 = smov [#allocation10]  }
  0x36   :  { %342 = vmatprep.mubr.bf16.mxu0 %v2128_v0  ;;  %383 = vmatprep.mubr.bf16.mxu1 %v2128_v0  ;;  %v1782_v2 = vld [vmem:[#allocation2 + $0xec] ss:$16 sps:$4 sm:$0xff]   ;;  %v1784_v3 = vld [vmem:[#allocation2 + $0xe0] ss:$16 sps:$4 sm:$0xff]   ;;  %v1785_v4 = vld [vmem:[#allocation2 + $0xe8] ss:$16 sps:$4 sm:$0xff]  }
  0x37   :  { %310 = vmatprep.subr.bf16.mxu0 %v1780_v1  ;;  %351 = vmatprep.subr.bf16.mxu1 %v1782_v2  ;;  %v1786_v5 = vld [vmem:[#allocation2 + $0xc4] ss:$16 sps:$4 sm:$0xff]   ;;  %v1788_v6 = vld [vmem:[#allocation2 + $0xcc] ss:$16 sps:$4 sm:$0xff]   ;;  %v1790_v7 = vld [vmem:[#allocation2 + $0xc0] ss:$16 sps:$4 sm:$0xff]  }
  0x38   :  { %311 = vmatpush1.bf16.msra.mxu0 %v1784_v3  ;;  %352 = vmatpush1.bf16.msra.mxu1 %v1785_v4  ;;  %v1791_v8 = vld [vmem:[#allocation2 + $0xc8] ss:$16 sps:$4 sm:$0xff]   ;;  %v1792_v9 = vld [vmem:[#allocation2 + $0xa4] ss:$16 sps:$4 sm:$0xff]   ;;  %v1794_v10 = vld [vmem:[#allocation2 + $0xac] ss:$16 sps:$4 sm:$0xff]  }
  0x39   :  { %312 = vmatprep.subr.bf16.mxu0 %v1786_v5  ;;  %353 = vmatprep.subr.bf16.mxu1 %v1788_v6  ;;  %v1796_v11 = vld [vmem:[#allocation2 + $0xa0] ss:$16 sps:$4 sm:$0xff]   ;;  %v1797_v12 = vld [vmem:[#allocation2 + $0xa8] ss:$16 sps:$4 sm:$0xff]   ;;  %v1798_v13 = vld [vmem:[#allocation2 + $0x84] ss:$16 sps:$4 sm:$0xff]  }
  0x3a   :  { %v1800_v14 = vld [vmem:[#allocation2 + $0x8c] ss:$16 sps:$4 sm:$0xff]   ;;  %v1802_v15 = vld [vmem:[#allocation2 + $0x80] ss:$16 sps:$4 sm:$0xff]   ;;  %v1803_v16 = vld [vmem:[#allocation2 + $0x88] ss:$16 sps:$4 sm:$0xff]  }
  0x3b   :  { %v1804_v17 = vld [vmem:[#allocation2 + $0x64] ss:$16 sps:$4 sm:$0xff]   ;;  %v1806_v18 = vld [vmem:[#allocation2 + $0x6c] ss:$16 sps:$4 sm:$0xff]   ;;  %v1808_v19 = vld [vmem:[#allocation2 + $0x60] ss:$16 sps:$4 sm:$0xff]  }
  0x3c   :  { %313 = vmatpush1.bf16.msra.mxu0 %v1790_v7  ;;  %354 = vmatpush1.bf16.msra.mxu1 %v1791_v8  ;;  %v1809_v20 = vld [vmem:[#allocation2 + $0x68] ss:$16 sps:$4 sm:$0xff]   ;;  %v1810_v21 = vld [vmem:[#allocation2 + $0x44] ss:$16 sps:$4 sm:$0xff]   ;;  %v1812_v22 = vld [vmem:[#allocation2 + $0x4c] ss:$16 sps:$4 sm:$0xff]  }
  0x3d   :  { %314 = vmatprep.subr.bf16.mxu0 %v1792_v9  ;;  %355 = vmatprep.subr.bf16.mxu1 %v1794_v10  ;;  %v1814_v23 = vld [vmem:[#allocation2 + $0x40] ss:$16 sps:$4 sm:$0xff]   ;;  %v1815_v24 = vld [vmem:[#allocation2 + $0x48] ss:$16 sps:$4 sm:$0xff]   ;;  %v1816_v25 = vld [vmem:[#allocation2 + $0x24] ss:$16 sps:$4 sm:$0xff]  }
  0x3e   :  { %v1818_v26 = vld [vmem:[#allocation2 + $0x2c] ss:$16 sps:$4 sm:$0xff]   ;;  %v1820_v27 = vld [vmem:[#allocation2 + $0x20] ss:$16 sps:$4 sm:$0xff]   ;;  %v1821_v28 = vld [vmem:[#allocation2 + $0x28] ss:$16 sps:$4 sm:$0xff]  }
  0x3f   :  { %v1822_v29 = vld [vmem:[#allocation2 + $0x4] ss:$16 sps:$4 sm:$0xff]   ;;  %v1824_v30 = vld [vmem:[#allocation2 + $0xc] ss:$16 sps:$4 sm:$0xff]   ;;  %v1826_v31 = vld [vmem:[#allocation2] ss:$16 sps:$4 sm:$0xff]  }
  0x40   :  { %315 = vmatpush1.bf16.msra.mxu0 %v1796_v11  ;;  %356 = vmatpush1.bf16.msra.mxu1 %v1797_v12  ;;  %v1827_v32 = vld [vmem:[#allocation2 + $0x8] ss:$16 sps:$4 sm:$0xff]   ;;  %v94_v33 = vld [vmem:[%s2257_s0] sm:$0xff]  ;;  %v1830_v34 = vld [vmem:[#allocation5 + $0x74] ss:$8 sps:$4 sm:$0xff]   ;;  %s1547_s12 = sshll.u32 %s2129_s30, 4  ;;  %s1548_s12 = int_to_ptr.vmem [resolvable:$true] %s1547_s12 }
  0x41   :  { %316 = vmatprep.subr.bf16.mxu0 %v1798_v13  ;;  %357 = vmatprep.subr.bf16.mxu1 %v1800_v14  ;;  %v1833_v35 = vld [vmem:[#allocation5 + $0x174] ss:$8 sps:$4 sm:$0xff]   ;;  %v95_v36 = vpack.c.bf16 %v94_v33, %v94_v33  ;;  %v1828_v37 = vld [vmem:[#allocation5 + $0x70] ss:$8 sps:$4 sm:$0xff]   ;;  %v1836_v39 = vld [vmem:[#allocation5 + $0x64] ss:$8 sps:$4 sm:$0xff]   ;;  %p2095_p7 = scmp.lt.s32.totalorder %s1548_s12, %s1548_s12 }
  0x42   :  { %v1831_v38 = vld [vmem:[#allocation5 + $0x170] ss:$8 sps:$4 sm:$0xff]   ;;  %v1839_v40 = vld [vmem:[#allocation5 + $0x164] ss:$8 sps:$4 sm:$0xff]   ;;  %v1834_v41 = vld [vmem:[#allocation5 + $0x60] ss:$8 sps:$4 sm:$0xff]  }
  0x43   :  { %v1837_v42 = vld [vmem:[#allocation5 + $0x160] ss:$8 sps:$4 sm:$0xff]   ;;  %v1842_v43 = vld [vmem:[#allocation5 + $0x54] ss:$8 sps:$4 sm:$0xff]   ;;  %v1840_v45 = vld [vmem:[#allocation5 + $0x50] ss:$8 sps:$4 sm:$0xff]  }
  0x44   :  { %317 = vmatpush1.bf16.msra.mxu0 %v1802_v15  ;;  %358 = vmatpush1.bf16.msra.mxu1 %v1803_v16  ;;  %v1845_v44 = vld [vmem:[#allocation5 + $0x154] ss:$8 sps:$4 sm:$0xff]   ;;  %v1843_v46 = vld [vmem:[#allocation5 + $0x150] ss:$8 sps:$4 sm:$0xff]   ;;  %v1848_v47 = vld [vmem:[#allocation5 + $0x44] ss:$8 sps:$4 sm:$0xff]  }
  0x45   :  { %318 = vmatprep.subr.bf16.mxu0 %v1804_v17  ;;  %359 = vmatprep.subr.bf16.mxu1 %v1806_v18  ;;  %v1851_v48 = vld [vmem:[#allocation5 + $0x144] ss:$8 sps:$4 sm:$0xff]   ;;  %v1846_v49 = vld [vmem:[#allocation5 + $0x40] ss:$8 sps:$4 sm:$0xff]   ;;  %v1854_v51 = vld [vmem:[#allocation5 + $0x34] ss:$8 sps:$4 sm:$0xff]  }
  0x46   :  { %v1849_v50 = vld [vmem:[#allocation5 + $0x140] ss:$8 sps:$4 sm:$0xff]   ;;  %v1857_v52 = vld [vmem:[#allocation5 + $0x134] ss:$8 sps:$4 sm:$0xff]   ;;  %v1852_v53 = vld [vmem:[#allocation5 + $0x30] ss:$8 sps:$4 sm:$0xff]  }
  0x47   :  { %v1855_v54 = vld [vmem:[#allocation5 + $0x130] ss:$8 sps:$4 sm:$0xff]   ;;  %v1860_v55 = vld [vmem:[#allocation5 + $0x24] ss:$8 sps:$4 sm:$0xff]   ;;  %v1858_v57 = vld [vmem:[#allocation5 + $0x20] ss:$8 sps:$4 sm:$0xff]  }
  0x48   :  { %319 = vmatpush1.bf16.msra.mxu0 %v1808_v19  ;;  %360 = vmatpush1.bf16.msra.mxu1 %v1809_v20  ;;  %v1863_v56 = vld [vmem:[#allocation5 + $0x124] ss:$8 sps:$4 sm:$0xff]   ;;  %v1861_v58 = vld [vmem:[#allocation5 + $0x120] ss:$8 sps:$4 sm:$0xff]   ;;  %v1866_v59 = vld [vmem:[#allocation5 + $0x14] ss:$8 sps:$4 sm:$0xff]  }
  0x49   :  { %320 = vmatprep.subr.bf16.mxu0 %v1810_v21  ;;  %361 = vmatprep.subr.bf16.mxu1 %v1812_v22  ;;  %v1869_v60 = vld [vmem:[#allocation5 + $0x114] ss:$8 sps:$4 sm:$0xff]   ;;  %v1864_v61 = vld [vmem:[#allocation5 + $0x10] ss:$8 sps:$4 sm:$0xff]   ;;  %v1872_v63 = vld [vmem:[#allocation5 + $0x4] ss:$8 sps:$4 sm:$0xff]  }
  0x4a   :  { %v1867_v62 = vld [vmem:[#allocation5 + $0x110] ss:$8 sps:$4 sm:$0xff]   ;;  %v1875_v1 = vld [vmem:[#allocation5 + $0x104] ss:$8 sps:$4 sm:$0xff]   ;;  %v1870_v2 = vld [vmem:[#allocation5] ss:$8 sps:$4 sm:$0xff]  }
  0x4b   :  { %v1873_v3 = vld [vmem:[#allocation5 + $0x100] ss:$8 sps:$4 sm:$0xff]   ;;  %v1878_v4 = vld [vmem:[#allocation5 + $0xf4] ss:$8 sps:$4 sm:$0xff]   ;;  %v1876_v6 = vld [vmem:[#allocation5 + $0xf0] ss:$8 sps:$4 sm:$0xff]  }
  0x4c   :  { %321 = vmatpush1.bf16.msra.mxu0 %v1814_v23  ;;  %362 = vmatpush1.bf16.msra.mxu1 %v1815_v24  ;;  %v1881_v5 = vld [vmem:[#allocation5 + $0x1f4] ss:$8 sps:$4 sm:$0xff]   ;;  %v1879_v7 = vld [vmem:[#allocation5 + $0x1f0] ss:$8 sps:$4 sm:$0xff]   ;;  %v1884_v8 = vld [vmem:[#allocation5 + $0xe4] ss:$8 sps:$4 sm:$0xff]  }
  0x4d   :  { %322 = vmatprep.subr.bf16.mxu0 %v1816_v25  ;;  %363 = vmatprep.subr.bf16.mxu1 %v1818_v26  ;;  %v1887_v9 = vld [vmem:[#allocation5 + $0x1e4] ss:$8 sps:$4 sm:$0xff]   ;;  %v1882_v10 = vld [vmem:[#allocation5 + $0xe0] ss:$8 sps:$4 sm:$0xff]   ;;  %v1890_v12 = vld [vmem:[#allocation5 + $0xd4] ss:$8 sps:$4 sm:$0xff]  }
  0x4e   :  { %v1885_v11 = vld [vmem:[#allocation5 + $0x1e0] ss:$8 sps:$4 sm:$0xff]   ;;  %v1893_v13 = vld [vmem:[#allocation5 + $0x1d4] ss:$8 sps:$4 sm:$0xff]   ;;  %v1888_v14 = vld [vmem:[#allocation5 + $0xd0] ss:$8 sps:$4 sm:$0xff]  }
  0x4f   :  { %v1891_v15 = vld [vmem:[#allocation5 + $0x1d0] ss:$8 sps:$4 sm:$0xff]   ;;  %v1896_v16 = vld [vmem:[#allocation5 + $0xc4] ss:$8 sps:$4 sm:$0xff]   ;;  %v1894_v18 = vld [vmem:[#allocation5 + $0xc0] ss:$8 sps:$4 sm:$0xff]  }
  0x50   :  { %323 = vmatpush1.bf16.msra.mxu0 %v1820_v27  ;;  %364 = vmatpush1.bf16.msra.mxu1 %v1821_v28  ;;  %v1899_v17 = vld [vmem:[#allocation5 + $0x1c4] ss:$8 sps:$4 sm:$0xff]   ;;  %v1897_v19 = vld [vmem:[#allocation5 + $0x1c0] ss:$8 sps:$4 sm:$0xff]   ;;  %v1902_v20 = vld [vmem:[#allocation5 + $0xb4] ss:$8 sps:$4 sm:$0xff]  }
  0x51   :  { %324 = vmatprep.subr.bf16.mxu0 %v1822_v29  ;;  %365 = vmatprep.subr.bf16.mxu1 %v1824_v30  ;;  %v1905_v21 = vld [vmem:[#allocation5 + $0x1b4] ss:$8 sps:$4 sm:$0xff]   ;;  %v1900_v22 = vld [vmem:[#allocation5 + $0xb0] ss:$8 sps:$4 sm:$0xff]   ;;  %v1908_v24 = vld [vmem:[#allocation5 + $0xa4] ss:$8 sps:$4 sm:$0xff]  }
  0x52   :  { %v1903_v23 = vld [vmem:[#allocation5 + $0x1b0] ss:$8 sps:$4 sm:$0xff]   ;;  %v1911_v25 = vld [vmem:[#allocation5 + $0x1a4] ss:$8 sps:$4 sm:$0xff]   ;;  %v1906_v26 = vld [vmem:[#allocation5 + $0xa0] ss:$8 sps:$4 sm:$0xff]  }
  0x53   :  { %v1909_v27 = vld [vmem:[#allocation5 + $0x1a0] ss:$8 sps:$4 sm:$0xff]   ;;  %v1914_v28 = vld [vmem:[#allocation5 + $0x94] ss:$8 sps:$4 sm:$0xff]   ;;  %v1912_v30 = vld [vmem:[#allocation5 + $0x90] ss:$8 sps:$4 sm:$0xff]  }
  0x54   :  { %325 = vmatpush1.bf16.msra.mxu0 %v1826_v31  ;;  %366 = vmatpush1.bf16.msra.mxu1 %v1827_v32  ;;  %v1917_v29 = vld [vmem:[#allocation5 + $0x194] ss:$8 sps:$4 sm:$0xff]   ;;  %v1915_v31 = vld [vmem:[#allocation5 + $0x190] ss:$8 sps:$4 sm:$0xff]   ;;  %v1920_v32 = vld [vmem:[#allocation5 + $0x84] ss:$8 sps:$4 sm:$0xff]  }
  0x55   :  { %796 = vmatprep.subr.bf16.mxu0 %v1830_v34  ;;  %837 = vmatprep.subr.bf16.mxu1 %v1833_v35  ;;  %v1923_v33 = vld [vmem:[#allocation5 + $0x184] ss:$8 sps:$4 sm:$0xff]   ;;  %v1918_v34 = vld [vmem:[#allocation5 + $0x80] ss:$8 sps:$4 sm:$0xff]  }
  0x56   :  { %v1921_v35 = vld [vmem:[#allocation5 + $0x180] ss:$8 sps:$4 sm:$0xff]  }
  0x57   :  { %343 = vmatmul.mubr.bf16.vlgmr.msra.gmra.mxu0 %v95_v36  ;;  %384 = vmatmul.mubr.bf16.vlgmr.msra.gmra.mxu1 %v95_v36  ;;  %v1926_v36 = vld [vmem:[#allocation7 + $0xe4] ss:$16 sps:$4 sm:$0xff]  }
  0x58   :  { %797 = vmatpush1.bf16.msra.mxu0 %v1828_v37  ;;  %838 = vmatpush1.bf16.msra.mxu1 %v1831_v38  ;;  %v1929_v37 = vld [vmem:[#allocation7 + $0xec] ss:$16 sps:$4 sm:$0xff]   ;;  %v130_v38 = vlaneseq }
  0x59   :  { %798 = vmatprep.subr.bf16.mxu0 %v1836_v39  ;;  %839 = vmatprep.subr.bf16.mxu1 %v1839_v40 }
  0x5a   :  { %v2207_v39 = vshrl.u32 %v130_v38, 7 }
  0x5c   :  { %799 = vmatpush1.bf16.msra.mxu0 %v1834_v41  ;;  %840 = vmatpush1.bf16.msra.mxu1 %v1837_v42  ;;  %v2210_v40 = vsub.s32 0, %v2207_v39  ;;  %v140_v41 = vsub.s32 2, %v2207_v39  ;;  %v128_v42 = vld [vmem:[%s2260_s3] sm:$0xf] }
  0x5d   :  { %800 = vmatprep.subr.bf16.mxu0 %v1842_v43  ;;  %841 = vmatprep.subr.bf16.mxu1 %v1845_v44  ;;  %v2217_v43 = vsub.s32 1, %v2207_v39  ;;  %v144_v44 = vsub.s32 3, %v2207_v39 }
  0x60   :  { %801 = vmatpush1.bf16.msra.mxu0 %v1840_v45  ;;  %842 = vmatpush1.bf16.msra.mxu1 %v1843_v46  ;;  %v133_v45 = vrot.slane %v128_v42, %v2210_v40  ;;  %v141_v46 = vrot.slane %v128_v42, %v140_v41 }
  0x61   :  { %802 = vmatprep.subr.bf16.mxu0 %v1848_v47  ;;  %843 = vmatprep.subr.bf16.mxu1 %v1851_v48  ;;  %v137_v47 = vrot.slane %v128_v42, %v2217_v43  ;;  %v145_v48 = vrot.slane %v128_v42, %v144_v44 }
  0x64   :  { %803 = vmatpush1.bf16.msra.mxu0 %v1846_v49  ;;  %844 = vmatpush1.bf16.msra.mxu1 %v1849_v50 }
  0x65   :  { %804 = vmatprep.subr.bf16.mxu0 %v1854_v51  ;;  %845 = vmatprep.subr.bf16.mxu1 %v1857_v52 }
  0x68   :  { %805 = vmatpush1.bf16.msra.mxu0 %v1852_v53  ;;  %846 = vmatpush1.bf16.msra.mxu1 %v1855_v54 }
  0x69   :  { %806 = vmatprep.subr.bf16.mxu0 %v1860_v55  ;;  %847 = vmatprep.subr.bf16.mxu1 %v1863_v56 }
  0x6c   :  { %807 = vmatpush1.bf16.msra.mxu0 %v1858_v57  ;;  %848 = vmatpush1.bf16.msra.mxu1 %v1861_v58 }
  0x6d   :  { %808 = vmatprep.subr.bf16.mxu0 %v1866_v59  ;;  %849 = vmatprep.subr.bf16.mxu1 %v1869_v60 }
  0x70   :  { %809 = vmatpush1.bf16.msra.mxu0 %v1864_v61  ;;  %850 = vmatpush1.bf16.msra.mxu1 %v1867_v62 }
  0x71   :  { %810 = vmatprep.subr.bf16.mxu0 %v1872_v63  ;;  %851 = vmatprep.subr.bf16.mxu1 %v1875_v1 }
  0x74   :  { %811 = vmatpush1.bf16.msra.mxu0 %v1870_v2  ;;  %852 = vmatpush1.bf16.msra.mxu1 %v1873_v3 }
  0x75   :  { %812 = vmatprep.subr.bf16.mxu0 %v1878_v4  ;;  %853 = vmatprep.subr.bf16.mxu1 %v1881_v5  ;;  %v1924_v5 = vld [vmem:[#allocation7 + $0xe0] ss:$16 sps:$4 sm:$0xff]  }
  0x78   :  { %813 = vmatpush2.bf16.msra.mxu0 %v1876_v6  ;;  %854 = vmatpush2.bf16.msra.mxu1 %v1879_v7  ;;  %v1927_v6 = vld [vmem:[#allocation7 + $0xe8] ss:$16 sps:$4 sm:$0xff]  }
  0x79   :  { %814 = vmatprep.subr.bf16.mxu0 %v1884_v8  ;;  %855 = vmatprep.subr.bf16.mxu1 %v1887_v9  ;;  %v1932_v8 = vld [vmem:[#allocation7 + $0xc4] ss:$16 sps:$4 sm:$0xff]   ;;  %v1935_v9 = vld [vmem:[#allocation7 + $0xcc] ss:$16 sps:$4 sm:$0xff]  }
  0x7c   :  { %815 = vmatpush2.bf16.msra.mxu0 %v1882_v10  ;;  %856 = vmatpush2.bf16.msra.mxu1 %v1885_v11  ;;  %v1930_v10 = vld [vmem:[#allocation7 + $0xc0] ss:$16 sps:$4 sm:$0xff]   ;;  %v1933_v11 = vld [vmem:[#allocation7 + $0xc8] ss:$16 sps:$4 sm:$0xff]  }
  0x7d   :  { %816 = vmatprep.subr.bf16.mxu0 %v1890_v12  ;;  %857 = vmatprep.subr.bf16.mxu1 %v1893_v13  ;;  %v1938_v12 = vld [vmem:[#allocation7 + $0xa4] ss:$16 sps:$4 sm:$0xff]   ;;  %v1941_v13 = vld [vmem:[#allocation7 + $0xac] ss:$16 sps:$4 sm:$0xff]  }
  0x80   :  { %817 = vmatpush2.bf16.msra.mxu0 %v1888_v14  ;;  %858 = vmatpush2.bf16.msra.mxu1 %v1891_v15  ;;  %v1936_v14 = vld [vmem:[#allocation7 + $0xa0] ss:$16 sps:$4 sm:$0xff]   ;;  %v1939_v15 = vld [vmem:[#allocation7 + $0xa8] ss:$16 sps:$4 sm:$0xff]  }
  0x81   :  { %818 = vmatprep.subr.bf16.mxu0 %v1896_v16  ;;  %859 = vmatprep.subr.bf16.mxu1 %v1899_v17  ;;  %v1944_v16 = vld [vmem:[#allocation7 + $0x84] ss:$16 sps:$4 sm:$0xff]   ;;  %v1947_v17 = vld [vmem:[#allocation7 + $0x8c] ss:$16 sps:$4 sm:$0xff]  }
  0x84   :  { %819 = vmatpush2.bf16.msra.mxu0 %v1894_v18  ;;  %860 = vmatpush2.bf16.msra.mxu1 %v1897_v19  ;;  %v1942_v18 = vld [vmem:[#allocation7 + $0x80] ss:$16 sps:$4 sm:$0xff]   ;;  %v1950_v19 = vld [vmem:[#allocation7 + $0x64] ss:$16 sps:$4 sm:$0xff]  }
  0x85   :  { %820 = vmatprep.subr.bf16.mxu0 %v1902_v20  ;;  %861 = vmatprep.subr.bf16.mxu1 %v1905_v21  ;;  %v1948_v20 = vld [vmem:[#allocation7 + $0x60] ss:$16 sps:$4 sm:$0xff]   ;;  %v1951_v21 = vld [vmem:[#allocation7 + $0x68] ss:$16 sps:$4 sm:$0xff]  }
  0x88   :  { %821 = vmatpush2.bf16.msra.mxu0 %v1900_v22  ;;  %862 = vmatpush2.bf16.msra.mxu1 %v1903_v23  ;;  %v1953_v22 = vld [vmem:[#allocation7 + $0x6c] ss:$16 sps:$4 sm:$0xff]   ;;  %v1956_v23 = vld [vmem:[#allocation7 + $0x44] ss:$16 sps:$4 sm:$0xff]  }
  0x89   :  { %822 = vmatprep.subr.bf16.mxu0 %v1908_v24  ;;  %863 = vmatprep.subr.bf16.mxu1 %v1911_v25  ;;  %v1959_v24 = vld [vmem:[#allocation7 + $0x4c] ss:$16 sps:$4 sm:$0xff]   ;;  %v1954_v25 = vld [vmem:[#allocation7 + $0x40] ss:$16 sps:$4 sm:$0xff]  }
  0x8c   :  { %823 = vmatpush2.bf16.msra.mxu0 %v1906_v26  ;;  %864 = vmatpush2.bf16.msra.mxu1 %v1909_v27  ;;  %v1957_v26 = vld [vmem:[#allocation7 + $0x48] ss:$16 sps:$4 sm:$0xff]   ;;  %v1962_v27 = vld [vmem:[#allocation7 + $0x24] ss:$16 sps:$4 sm:$0xff]  }
  0x8d   :  { %824 = vmatprep.subr.bf16.mxu0 %v1914_v28  ;;  %865 = vmatprep.subr.bf16.mxu1 %v1917_v29  ;;  %v1965_v28 = vld [vmem:[#allocation7 + $0x2c] ss:$16 sps:$4 sm:$0xff]   ;;  %v1960_v29 = vld [vmem:[#allocation7 + $0x20] ss:$16 sps:$4 sm:$0xff]  }
  0x90   :  { %825 = vmatpush2.bf16.msra.mxu0 %v1912_v30  ;;  %866 = vmatpush2.bf16.msra.mxu1 %v1915_v31  ;;  %v1963_v30 = vld [vmem:[#allocation7 + $0x28] ss:$16 sps:$4 sm:$0xff]   ;;  %v1968_v31 = vld [vmem:[#allocation7 + $0x4] ss:$16 sps:$4 sm:$0xff]  }
  0x91   :  { %826 = vmatprep.subr.bf16.mxu0 %v1920_v32  ;;  %867 = vmatprep.subr.bf16.mxu1 %v1923_v33  ;;  %v1971_v32 = vld [vmem:[#allocation7 + $0xc] ss:$16 sps:$4 sm:$0xff]   ;;  %v1966_v33 = vld [vmem:[#allocation7] ss:$16 sps:$4 sm:$0xff]  }
  0x94   :  { %827 = vmatpush2.bf16.msra.mxu0 %v1918_v34  ;;  %868 = vmatpush2.bf16.msra.mxu1 %v1921_v35  ;;  %v1969_v34 = vld [vmem:[#allocation7 + $0x8] ss:$16 sps:$4 sm:$0xff]  }
  0x95   :  { %1099 = vmatprep.subr.bf16.mxu0 %v1926_v36  ;;  %1140 = vmatprep.subr.bf16.mxu1 %v1929_v37  ;;  %v1972_v35 = vld [vmem:[#allocation8 + $0x78] sm:$0xff]   ;;  %v464_v37 = vld [vmem:[%s2262_s5] sm:$0x3] }
  0x96   :  { %v1973_v36 = vld [vmem:[#allocation8 + $0xf8] sm:$0xff]   ;;  %v469_v38 = vrot.slane %v464_v37, %v2210_v40  ;;  %v473_v42 = vrot.slane %v464_v37, %v2217_v43 }
 0x117   :  { %v344_v49 = vpop.f32.mrf.mxu0  ;;  %v385_v50 = vpop.f32.mrf.mxu1 }
 0x118   :  { %v345_v51 = vadd.f32 %v344_v49, %v133_v45  ;;  %v386_v52 = vadd.f32 %v385_v50, %v141_v46 }
 0x119   :  { %v346_v53 = vpop.f32.mrf.mxu0  ;;  %v387_v54 = vpop.f32.mrf.mxu1 }
 0x11a   :  { %v394_v55 = vmax.f32 %v386_v52, 0.0  ;;  %v347_v56 = vadd.f32 %v346_v53, %v137_v47  ;;  %v388_v57 = vadd.f32 %v387_v54, %v145_v48  ;;  %v392_v58 = vmax.f32 %v345_v51, 0.0 }
 0x11b   :  { %v348_v59 = vpop.f32.mrf.mxu0  ;;  %v389_v60 = vpop.f32.mrf.mxu1 }
 0x11c   :  { %v393_v61 = vmax.f32 %v347_v56, 0.0  ;;  %v395_v62 = vmax.f32 %v388_v57, 0.0  ;;  %v398_v63 = vpack.c.bf16 %v394_v55, %v394_v55  ;;  %v396_v7 = vpack.c.bf16 %v392_v58, %v392_v58  ;;  %v881_v59 = vld [vmem:[%s2258_s1] sm:$0xff] }
 0x11d   :  { %v349_v1 = vpop.f32.mrf.mxu0  ;;  %v390_v2 = vpop.f32.mrf.mxu1 }
 0x11e   :  { %v397_v3 = vpack.c.bf16 %v393_v61, %v393_v61  ;;  %v399_v4 = vpack.c.bf16 %v395_v62, %v395_v62  ;;  %v1975_v1 = vld [vmem:[#allocation8 + $0xb8] sm:$0xff]  }
 0x120   :  { %828 = vmatprep.mubr.bf16.mxu0 %v397_v3  ;;  %869 = vmatprep.mubr.bf16.mxu1 %v399_v4  ;;  %v1976_v3 = vld [vmem:[#allocation8 + $0x70] sm:$0xff]  }
 0x121   :  { %829 = vmatmul.mubr.bf16.vlgmr.msra.gmra.mxu0 %v396_v7  ;;  %870 = vmatmul.mubr.bf16.vlgmr.msra.gmra.mxu1 %v398_v63  ;;  %v1974_v63 = vld [vmem:[#allocation8 + $0x38] sm:$0xff]   ;;  %v1977_v4 = vld [vmem:[#allocation8 + $0xf0] sm:$0xff]   ;;  %v1980_v7 = vld [vmem:[#allocation8 + $0x68] sm:$0xff]  }
 0x122   :  { %1100 = vmatpush1.bf16.msra.mxu0 %v1924_v5  ;;  %1141 = vmatpush1.bf16.msra.mxu1 %v1927_v6  ;;  %v1978_v5 = vld [vmem:[#allocation8 + $0x30] sm:$0xff]  }
 0x123   :  { %1131 = vmatprep.mubr.bf16.mxu0 %v2128_v0  ;;  %1172 = vmatprep.mubr.bf16.mxu1 %v2128_v0  ;;  %v1945_v0 = vld [vmem:[#allocation7 + $0x88] ss:$16 sps:$4 sm:$0xff]   ;;  %v1979_v6 = vld [vmem:[#allocation8 + $0xb0] sm:$0xff]  }
 0x124   :  { %1101 = vmatprep.subr.bf16.mxu0 %v1932_v8  ;;  %1142 = vmatprep.subr.bf16.mxu1 %v1935_v9  ;;  %v1981_v8 = vld [vmem:[#allocation8 + $0xe8] sm:$0xff]  }
 0x125   :  { %v1982_v9 = vld [vmem:[#allocation8 + $0x28] sm:$0xff]  }
 0x126   :  { %1102 = vmatpush1.bf16.msra.mxu0 %v1930_v10  ;;  %1143 = vmatpush1.bf16.msra.mxu1 %v1933_v11  ;;  %v1983_v10 = vld [vmem:[#allocation8 + $0xa8] sm:$0xff]   ;;  %v1984_v11 = vld [vmem:[#allocation8 + $0x60] sm:$0xff]  }
 0x127   :  { %1103 = vmatprep.subr.bf16.mxu0 %v1938_v12  ;;  %1144 = vmatprep.subr.bf16.mxu1 %v1941_v13  ;;  %v1985_v12 = vld [vmem:[#allocation8 + $0xe0] sm:$0xff]  }
 0x128   :  { %v1986_v13 = vld [vmem:[#allocation8 + $0x20] sm:$0xff]  }
 0x12a   :  { %1104 = vmatpush1.bf16.msra.mxu0 %v1936_v14  ;;  %1145 = vmatpush1.bf16.msra.mxu1 %v1939_v15  ;;  %v1987_v14 = vld [vmem:[#allocation8 + $0xa0] sm:$0xff]   ;;  %v1988_v15 = vld [vmem:[#allocation8 + $0x58] sm:$0xff]  }
 0x12b   :  { %1105 = vmatprep.subr.bf16.mxu0 %v1944_v16  ;;  %1146 = vmatprep.subr.bf16.mxu1 %v1947_v17  ;;  %v1989_v16 = vld [vmem:[#allocation8 + $0xd8] sm:$0xff]  }
 0x12c   :  { %v1990_v17 = vld [vmem:[#allocation8 + $0x18] sm:$0xff]  }
 0x12e   :  { %1106 = vmatpush1.bf16.msra.mxu0 %v1942_v18  ;;  %1147 = vmatpush1.bf16.msra.mxu1 %v1945_v0  ;;  %v1991_v18 = vld [vmem:[#allocation8 + $0x98] sm:$0xff]   ;;  %v1992_v0 = vld [vmem:[#allocation8 + $0x50] sm:$0xff]  }
 0x12f   :  { %1107 = vmatprep.subr.bf16.mxu0 %v1950_v19  ;;  %1148 = vmatprep.subr.bf16.mxu1 %v1953_v22  ;;  %v1993_v19 = vld [vmem:[#allocation8 + $0xd0] sm:$0xff]   ;;  %v1996_v22 = vld [vmem:[#allocation8 + $0x48] sm:$0xff]  }
 0x132   :  { %1108 = vmatpush1.bf16.msra.mxu0 %v1948_v20  ;;  %1149 = vmatpush1.bf16.msra.mxu1 %v1951_v21  ;;  %v1994_v20 = vld [vmem:[#allocation8 + $0x10] sm:$0xff]  }
 0x133   :  { %1109 = vmatprep.subr.bf16.mxu0 %v1956_v23  ;;  %1150 = vmatprep.subr.bf16.mxu1 %v1959_v24  ;;  %v1995_v21 = vld [vmem:[#allocation8 + $0x90] sm:$0xff]   ;;  %v1997_v23 = vld [vmem:[#allocation8 + $0xc8] sm:$0xff]  }
 0x134   :  { %v1998_v24 = vld [vmem:[#allocation8 + $0x8] sm:$0xff]  }
 0x136   :  { %1110 = vmatpush1.bf16.msra.mxu0 %v1954_v25  ;;  %1151 = vmatpush1.bf16.msra.mxu1 %v1957_v26  ;;  %v1999_v25 = vld [vmem:[#allocation8 + $0x88] sm:$0xff]   ;;  %v2000_v26 = vld [vmem:[#allocation8 + $0x40] sm:$0xff]  }
 0x137   :  { %1111 = vmatprep.subr.bf16.mxu0 %v1962_v27  ;;  %1152 = vmatprep.subr.bf16.mxu1 %v1965_v28  ;;  %v2001_v27 = vld [vmem:[#allocation8 + $0xc0] sm:$0xff]  }
 0x138   :  { %v2002_v28 = vld [vmem:[#allocation8] sm:$0xff]  }
 0x13a   :  { %1112 = vmatpush1.bf16.msra.mxu0 %v1960_v29  ;;  %1153 = vmatpush1.bf16.msra.mxu1 %v1963_v30  ;;  %v2003_v29 = vld [vmem:[#allocation8 + $0x80] sm:$0xff]  }
 0x13b   :  { %1113 = vmatprep.subr.bf16.mxu0 %v1968_v31  ;;  %1154 = vmatprep.subr.bf16.mxu1 %v1971_v32  ;;  %v917_v30 = vld [vmem:[%s2264_s7] sm:$0xf] }
 0x13c   :  { %v922_v31 = vrot.slane %v917_v30, %v2210_v40  ;;  %v930_v32 = vrot.slane %v917_v30, %v140_v41 }
 0x13e   :  { %1114 = vmatpush1.bf16.msra.mxu0 %v1966_v33  ;;  %1155 = vmatpush1.bf16.msra.mxu1 %v1969_v34  ;;  %v926_v33 = vrot.slane %v917_v30, %v2217_v43  ;;  %v934_v34 = vrot.slane %v917_v30, %v144_v44 }
 0x13f   :  { %1724 = vmatprep.subr.bf16.mxu0 %v1972_v35  ;;  %1746 = vmatprep.subr.bf16.mxu1 %v1973_v36 }
 0x1e1   :  { %v830_v45 = vpop.f32.mrf.mxu0  ;;  %v871_v46 = vpop.f32.mrf.mxu1 }
 0x1e2   :  { %v831_v47 = vadd.f32 %v830_v45, %v469_v38 }
 0x1e3   :  { %v832_v48 = vpop.f32.mrf.mxu0  ;;  %v873_v49 = vpop.f32.mrf.mxu1 }
 0x1e4   :  { %v872_v50 = vadd.f32 %v871_v46, %v831_v47  ;;  %v833_v51 = vadd.f32 %v832_v48, %v473_v42 }
 0x1e5   :  { %v834_v52 = vpop.f32.mrf.mxu0  ;;  %v875_v53 = vpop.f32.mrf.mxu1 }
 0x1e6   :  { %1539 = vst [vmem:[%s2268_s11] sm:$0xff] %v872_v50  ;;  %v874_v54 = vadd.f32 %v873_v49, %v833_v51 }
 0x1e7   :  { %v835_v55 = vpop.f32.mrf.mxu0  ;;  %v876_v56 = vpop.f32.mrf.mxu1 }
 0x1e8   :  { %v878_v57 = vmul.f32 0.5, %v874_v54  ;;  %1540 = vst [vmem:[%s2268_s11 + $0x8] sm:$0xff] %v874_v54 }
 0x1ea   :  { %v879_v58 = vmul.f32 1.442695, %v878_v57  ;;  %v1690_v57 = vld [vmem:[%s2266_s9] ss:$0 sm:$0xff]  ;;  %s2090_s9 = scalar_lea.vmem %s1548_s12, 128 }
 0x1eb   :  { %p2091_p6 = scmp.ne.s32.totalorder %s1548_s12, %s2090_s9  ;;  %p2096_p8 = scmp.lt.s32.totalorder %s2090_s9, %s2090_s9 }
 0x1ec   :  { %2004 = vpow2.f32 %v879_v58 }
 0x1ed   :  { %p2097_p9 = por %p2096_p8, %p2095_p7 }
 0x1ef   :  { %p2098_p10 = pnand %p2097_p9, %p2091_p6 }
 0x1f9   :  { %v2005_v60 = vpop.eup %2004 }
 0x1fa   :  { %v882_v61 = vmul.f32 %v2005_v60, %v881_v59 }
 0x1fc   :  { %v883_v62 = vadd.f32 %v882_v61, %v872_v50 }
 0x1fe   :  { %v884_v2 = vpack.c.bf16 %v883_v62, %v883_v62 }
 0x200   :  { %1132 = vmatmul.mubr.bf16.vlgmr.msra.gmra.mxu0 %v884_v2  ;;  %1173 = vmatmul.mubr.bf16.vlgmr.msra.gmra.mxu1 %v884_v2 }
 0x201   :  { %1725 = vmatpush3.bf16.msra.mxu0 %v1974_v63  ;;  %1747 = vmatpush3.bf16.msra.mxu1 %v1975_v1 }
 0x202   :  { %1726 = vmatprep.subr.bf16.mxu0 %v1976_v3  ;;  %1748 = vmatprep.subr.bf16.mxu1 %v1977_v4 }
 0x205   :  { %1727 = vmatpush3.bf16.msra.mxu0 %v1978_v5  ;;  %1749 = vmatpush3.bf16.msra.mxu1 %v1979_v6 }
 0x206   :  { %1728 = vmatprep.subr.bf16.mxu0 %v1980_v7  ;;  %1750 = vmatprep.subr.bf16.mxu1 %v1981_v8 }
 0x209   :  { %1729 = vmatpush3.bf16.msra.mxu0 %v1982_v9  ;;  %1751 = vmatpush3.bf16.msra.mxu1 %v1983_v10 }
 0x20a   :  { %1730 = vmatprep.subr.bf16.mxu0 %v1984_v11  ;;  %1752 = vmatprep.subr.bf16.mxu1 %v1985_v12 }
 0x20d   :  { %1731 = vmatpush3.bf16.msra.mxu0 %v1986_v13  ;;  %1753 = vmatpush3.bf16.msra.mxu1 %v1987_v14 }
 0x20e   :  { %1732 = vmatprep.subr.bf16.mxu0 %v1988_v15  ;;  %1754 = vmatprep.subr.bf16.mxu1 %v1989_v16 }
 0x211   :  { %1733 = vmatpush3.bf16.msra.mxu0 %v1990_v17  ;;  %1755 = vmatpush3.bf16.msra.mxu1 %v1991_v18 }
 0x212   :  { %1734 = vmatprep.subr.bf16.mxu0 %v1992_v0  ;;  %1756 = vmatprep.subr.bf16.mxu1 %v1993_v19 }
 0x215   :  { %1735 = vmatpush3.bf16.msra.mxu0 %v1994_v20  ;;  %1757 = vmatpush3.bf16.msra.mxu1 %v1995_v21 }
 0x216   :  { %1736 = vmatprep.subr.bf16.mxu0 %v1996_v22  ;;  %1758 = vmatprep.subr.bf16.mxu1 %v1997_v23 }
 0x219   :  { %1737 = vmatpush3.bf16.msra.mxu0 %v1998_v24  ;;  %1759 = vmatpush3.bf16.msra.mxu1 %v1999_v25 }
 0x21a   :  { %1738 = vmatprep.subr.bf16.mxu0 %v2000_v26  ;;  %1760 = vmatprep.subr.bf16.mxu1 %v2001_v27 }
 0x21d   :  { %1739 = vmatpush3.bf16.msra.mxu0 %v2002_v28  ;;  %1761 = vmatpush3.bf16.msra.mxu1 %v2003_v29 }
 0x2c0   :  { %v1133_v35 = vpop.f32.mrf.mxu0  ;;  %v1174_v36 = vpop.f32.mrf.mxu1 }
 0x2c1   :  { %v1134_v37 = vadd.f32 %v1133_v35, %v922_v31  ;;  %v1175_v38 = vadd.f32 %v1174_v36, %v930_v32 }
 0x2c2   :  { %v1135_v42 = vpop.f32.mrf.mxu0  ;;  %v1176_v45 = vpop.f32.mrf.mxu1 }
 0x2c3   :  { %v1136_v46 = vadd.f32 %v1135_v42, %v926_v33  ;;  %v1177_v47 = vadd.f32 %v1176_v45, %v934_v34  ;;  %v1181_v48 = vmax.f32 %v1134_v37, 0.0  ;;  %v1183_v49 = vmax.f32 %v1175_v38, 0.0 }
 0x2c4   :  { %v1137_v50 = vpop.f32.mrf.mxu0  ;;  %v1178_v40 = vpop.f32.mrf.mxu1 }
 0x2c5   :  { %v1182_v51 = vmax.f32 %v1136_v46, 0.0  ;;  %v1184_v52 = vmax.f32 %v1177_v47, 0.0  ;;  %v1185_v39 = vpack.c.bf16 %v1181_v48, %v1181_v48  ;;  %v1187_v44 = vpack.c.bf16 %v1183_v49, %v1183_v49 }
 0x2c6   :  { %v1138_v41 = vpop.f32.mrf.mxu0  ;;  %v1179_v53 = vpop.f32.mrf.mxu1 }
 0x2c7   :  { %v1186_v43 = vpack.c.bf16 %v1182_v51, %v1182_v51  ;;  %v1188_v54 = vpack.c.bf16 %v1184_v52, %v1184_v52 }
 0x2c9   :  { %1484 = vmatprep.mubr.bf16.mxu0 %v1186_v43  ;;  %1524 = vmatprep.mubr.bf16.mxu1 %v1188_v54 }
 0x2ca   :  { %1485 = vmatmul.mubr.bf16.vlgmr.msra.gmra.mxu0 %v1185_v39  ;;  %1525 = vmatmul.mubr.bf16.vlgmr.msra.gmra.mxu1 %v1187_v44 }
 0x38a   :  { %v1740_v55 = vpop.f32.mrf.mxu0  ;;  %v1762_v56 = vpop.f32.mrf.mxu1 }
 0x38c   :  { %v1741_v58 = vpop.f32.mrf.mxu0  ;;  %v1763_v59 = vpop.f32.mrf.mxu1 }
 0x38d   :  { %v1742_v60 = vadd.f32 %v1741_v58, %v1740_v55  ;;  %v1764_v1 = vadd.f32 %v1763_v59, %v1762_v56 }
 0x38e   :  { %v1743_v61 = vpop.f32.mrf.mxu0  ;;  %v1765_v62 = vpop.f32.mrf.mxu1 }
 0x38f   :  { %v1487_v63 = vadd.f32 %v1742_v60, %v1690_v57 }
 0x390   :  { %v1744_v2 = vpop.f32.mrf.mxu0  ;;  %v1766_v3 = vpop.f32.mrf.mxu1 }
 0x391   :  { %v1527_v4 = vadd.f32 %v1764_v1, %v1487_v63 }
 0x393   :  { %v1723_v5 = vmul.f32 -1.442695, %v1527_v4 }
 0x395   :  { %2006 = vpow2.f32 %v1723_v5 }
 0x3a2   :  { %v2007_v6 = vpop.eup %2006 }
 0x3a3   :  { %v1535_v7 = vadd.f32 1.0, %v2007_v6 }
 0x3a5   :  { %2008 = vrcp.f32 %v1535_v7 }
 0x3b2   :  { %v2009_v8 = vpop.eup %2008 }
 0x3b3   :  { %1538 = vst [vmem:[#allocation10] sm:$0xff] %v2009_v8 }
 0x3b4   :  { %2101 = shalt.err (!%p2098_p10)
}
 0x3b5   :  { %1550 = dma.vmem_to_hbm [thread:$0]  %s1548_s12, 128, %s2267_s10, [#allocation4]  }
 0x3b6   :  { %2116 = dma.done.wait [#allocation4], 128  }
 0x3b7   :  { %2117 = vsyncadd [#allocation4], 4294967168 }
 0x3b8   :  { %1558 = vsyncpa [#allocation3], 1 }
 0x3b9   :  { %1559 = vsyncpa [#allocation6], 1 }
 0x3ba   :  { %1560 = vsyncpa [#allocation9], 1 }
 0x3bb   :  { %1561 = vsyncpa [#allocation4], 1 }

</bundles_post_ra>
